<compile_context>
chip_gen: v7x
topology: tpu7x:2x2x1
jax: 0.10.0
libtpu: 0.0.40
codegen_flags: <defaults>
</compile_context>

<pallas_src>
import functools
import math

import jax
import jax.numpy as jnp
from jax.experimental import pallas as pl
from jax.experimental.pallas import tpu as pltpu

LSTM_LAYERS = 1
LSTM_HIDDEN = 32
BIDIRECTIONAL = True
BN_EPS = 1e-5
_VMEM_LIMIT = 48 * 1024 * 1024      # fits v5e/v6e (128 MiB) and v7x (64 MiB)
_ROW_TILE_CAP = 1024                # row tile for pointwise kernels


def _row_tile(rows, cap=_ROW_TILE_CAP):
    return cap if rows > cap else rows


def _frames_per_step(n_frames, hw, target=256):
    """Frames per grid step so per-step matmuls have >= `target` rows, while
    keeping >= 2 grid iterations (v7x megacore) and F | n_frames."""
    want = max(1, -(-target // hw))
    cap = max(1, n_frames // 2)
    f = max(1, min(want, cap, n_frames))
    while n_frames % f:
        f -= 1
    return f


def _cparams(semantics):
    return pltpu.CompilerParams(dimension_semantics=semantics,
                                vmem_limit_bytes=_VMEM_LIMIT)


# ---------------------------------------------------------------------------
# Kernels
# ---------------------------------------------------------------------------
def _pw_kernel(x_ref, w_ref, s_ref, b_ref, o_ref, *, relu6):
    # pointwise conv / linear (bf16 matmul, f32 accumulate) + scale/bias (+ReLU6)
    y = jnp.dot(x_ref[...], w_ref[...], preferred_element_type=jnp.float32)
    y = y * s_ref[...] + b_ref[...]
    if relu6:
        y = jnp.clip(y, 0.0, 6.0)
    o_ref[...] = y.astype(o_ref.dtype)


def _fused_ir_s1_kernel(x_ref, *refs, F, H, W, expand, use_res):
    # F stride-1 InvertedResidual frames per grid step:
    #   expand pw (ONE whole-frame matmul) -> halo scratch -> depthwise 3x3
    #   (VPU per-row) -> project pw (ONE whole-frame matmul) + BN (+ residual)
    off = 3 if expand else 0
    if expand:
        w1 = refs[0][...]
        s1 = refs[1][...]
        b1 = refs[2][...]
    wdw_ref, sdw_ref, bdw_ref = refs[off], refs[off + 1], refs[off + 2]
    w2 = refs[off + 3][...]
    s2 = refs[off + 4][...]
    b2 = refs[off + 5][...]
    o_ref = refs[off + 6]
    pad_ref = refs[off + 7]                    # (H+2, W+2, hidden) VMEM bf16
    d_ref = refs[off + 8]                      # (H*W, hidden)     VMEM bf16
    hidden = wdw_ref.shape[-1]
    wdw = [wdw_ref[k] for k in range(9)]
    sdw = sdw_ref[...]
    bdw = bdw_ref[...]

    # zero only the 1-px halo border; the interior is fully rewritten per frame
    pad_ref[0] = jnp.zeros((W + 2, hidden), pad_ref.dtype)
    pad_ref[H + 1] = jnp.zeros((W + 2, hidden), pad_ref.dtype)
    pad_ref[1:H + 1, 0:1, :] = jnp.zeros((H, 1, hidden), pad_ref.dtype)
    pad_ref[1:H + 1, W + 1:W + 2, :] = jnp.zeros((H, 1, hidden), pad_ref.dtype)

    for f in range(F):                         # static frame batch
        x_f = x_ref[f]                         # (H*W, Cin) bf16
        if expand:
            h = jnp.dot(x_f, w1, preferred_element_type=jnp.float32)
            h = jnp.clip(h * s1 + b1, 0.0, 6.0).astype(pad_ref.dtype)
        else:
            h = x_f

        for r in range(H):                     # halo interior fill: stores only
            pad_ref[r + 1, 1:W + 1, :] = h[r * W:(r + 1) * W, :]

        for r in range(H):                     # depthwise 3x3 -> d_ref
            acc = jnp.zeros((W, hidden), jnp.float32)
            for k in range(9):
                kh, kw = k // 3, k % 3
                tap = pad_ref[r + kh, kw:kw + W, :].astype(jnp.float32)
                acc = acc + tap * wdw[k]
            d_ref[r * W:(r + 1) * W, :] = jnp.clip(
                acc * sdw + bdw, 0.0, 6.0).astype(d_ref.dtype)

        y = jnp.dot(d_ref[...], w2, preferred_element_type=jnp.float32)
        y = y * s2 + b2
        if use_res:
            y = y + x_f.astype(jnp.float32)
        o_ref[f] = y.astype(o_ref.dtype)


def _fused_ir_s2_kernel(pee_ref, peo_ref, poe_ref, poo_ref, *refs,
                        F, H, W, Ho, Wo, expand):
    # F stride-2 InvertedResidual frames per grid step.  Inputs are 4 parity
    # maps of the zero-padded input (built cheaply in XLA at Cin resolution):
    # stride-2 depthwise taps become stride-1 slices of the (in-kernel)
    # expanded parity maps, so the expanded feature map never hits HBM.
    off = 3 if expand else 0
    if expand:
        w1 = refs[0][...]
        s1 = refs[1][...]
        b1 = refs[2][...]
    wdw_ref, sdw_ref, bdw_ref = refs[off], refs[off + 1], refs[off + 2]
    w2 = refs[off + 3][...]
    s2 = refs[off + 4][...]
    b2 = refs[off + 5][...]
    o_ref = refs[off + 6]
    d_ref = refs[off + 7]                      # (Ho*Wo, hidden) VMEM bf16
    hidden = wdw_ref.shape[-1]
    wdw = [wdw_ref[k] for k in range(9)]
    sdw = sdw_ref[...]
    bdw = bdw_ref[...]
    Hp, Wp = Ho + 1, Wo + 1

    # masks of zero-padding positions inside each parity map (the reference
    # model pads AFTER the expand conv, so pad positions must stay exactly 0).
    pidx = jax.lax.broadcasted_iota(jnp.int32, (Hp * Wp, 1), 0)
    ri = pidx // Wp
    ci = pidx - ri * Wp

    def pad_mask(z_row0, z_rowl, z_col0, z_coll):
        if not (z_row0 or z_rowl or z_col0 or z_coll):
            return None
        bad = jnp.zeros((Hp * Wp, 1), jnp.bool_)
        if z_row0:
            bad = bad | (ri == 0)
        if z_rowl:
            bad = bad | (ri == Hp - 1)
        if z_col0:
            bad = bad | (ci == 0)
        if z_coll:
            bad = bad | (ci == Wp - 1)
        return bad

    h_odd, w_odd = (H % 2 == 1), (W % 2 == 1)
    masks = (pad_mask(True, h_odd, True, w_odd),    # EE (even row, even col)
             pad_mask(True, h_odd, False, False),   # EO
             pad_mask(False, False, True, w_odd),   # OE
             None)                                  # OO

    def expand_map(v):
        if expand:
            v = jnp.dot(v, w1, preferred_element_type=jnp.float32)
            v = jnp.clip(v * s1 + b1, 0.0, 6.0).astype(jnp.bfloat16)
        return v

    for f in range(F):                         # static frame batch
        hmaps = []
        for ref, bad in zip((pee_ref, peo_ref, poe_ref, poo_ref), masks):
            v = expand_map(ref[f])             # (Hp*Wp, hidden) bf16
            if bad is not None:
                v = jnp.where(bad, jnp.zeros_like(v), v)
            hmaps.append(v)

        for i in range(Ho):                    # depthwise 3x3, stride 2
            acc = jnp.zeros((Wo, hidden), jnp.float32)
            for k in range(9):
                kh, kw = k // 3, k % 3
                m = hmaps[(kh % 2) * 2 + (kw % 2)]
                base = (i + kh // 2) * Wp + kw // 2
                acc = acc + m[base:base + Wo, :].astype(jnp.float32) * wdw[k]
            d_ref[i * Wo:(i + 1) * Wo, :] = jnp.clip(
                acc * sdw + bdw, 0.0, 6.0).astype(d_ref.dtype)

        y = jnp.dot(d_ref[...], w2, preferred_element_type=jnp.float32)
        o_ref[f] = (y * s2 + b2).astype(o_ref.dtype)


def _convl_pool_kernel(x_ref, w_ref, s_ref, b_ref, o_ref, *, F):
    # conv_1x1_bn(., 1280) + ReLU6 fused with the spatial mean pool
    w = w_ref[...]
    s = s_ref[...]
    b = b_ref[...]
    for f in range(F):
        y = jnp.dot(x_ref[f], w, preferred_element_type=jnp.float32)
        y = jnp.clip(y * s + b, 0.0, 6.0)
        o_ref[f] = jnp.mean(y, axis=0, keepdims=True).astype(o_ref.dtype)


def _lstm_seq_kernel(proj_ref, whh_ref, o_ref, *, hidden, T, B):
    # grid = (ndir,): the whole sequence runs in one in-kernel loop.  The
    # 1280->4H input projection (with biases folded) is hoisted outside; only
    # the tiny (B,H)x(H,4H) recurrence + gate math runs per timestep.
    d = pl.program_id(0)
    whh = whh_ref[0]                                   # (H, 4H) bf16

    def step(t, carry):
        h, c = carry
        t_eff = t + d * (T - 1 - 2 * t)                # d=0: t ; d=1: T-1-t
        g = proj_ref[0, t_eff] + jnp.dot(
            h.astype(jnp.bfloat16), whh, preferred_element_type=jnp.float32)
        i_g = jax.nn.sigmoid(g[:, 0 * hidden:1 * hidden])
        f_g = jax.nn.sigmoid(g[:, 1 * hidden:2 * hidden])
        g_g = jnp.tanh(g[:, 2 * hidden:3 * hidden])
        o_g = jax.nn.sigmoid(g[:, 3 * hidden:4 * hidden])
        c_new = f_g * c + i_g * g_g
        h_new = o_g * jnp.tanh(c_new)
        o_ref[0, t_eff] = h_new.astype(o_ref.dtype)
        return h_new, c_new

    zeros = jnp.zeros((B, hidden), jnp.float32)
    jax.lax.fori_loop(0, T, step, (zeros, zeros))


# ---------------------------------------------------------------------------
# pallas_call wrappers
# ---------------------------------------------------------------------------
def _pw_call(x, w, s, b, relu6, out_dtype=jnp.bfloat16):
    R, cin = x.shape
    cout = w.shape[1]
    tr = _row_tile(R)
    return pl.pallas_call(
        functools.partial(_pw_kernel, relu6=relu6),
        grid=(pl.cdiv(R, tr),),
        in_specs=[pl.BlockSpec((tr, cin), lambda i: (i, 0)),
                  pl.BlockSpec((cin, cout), lambda i: (0, 0)),
                  pl.BlockSpec((1, cout), lambda i: (0, 0)),
                  pl.BlockSpec((1, cout), lambda i: (0, 0))],
        out_specs=pl.BlockSpec((tr, cout), lambda i: (i, 0)),
        out_shape=jax.ShapeDtypeStruct((R, cout), out_dtype),
        compiler_params=_cparams(("parallel",)),
    )(x, w, s, b)


def _weight_specs(p, cin, hidden, oup):
    args, specs = [], []
    if p["expand"]:
        args += [p["pw1_w"], p["pw1_s"], p["pw1_b"]]
        specs += [pl.BlockSpec((cin, hidden), lambda n: (0, 0)),
                  pl.BlockSpec((1, hidden), lambda n: (0, 0)),
                  pl.BlockSpec((1, hidden), lambda n: (0, 0))]
    args += [p["dw_w"], p["dw_s"], p["dw_b"],
             p["pw2_w"], p["pw2_s"], p["pw2_b"]]
    specs += [pl.BlockSpec((9, 1, hidden), lambda n: (0, 0, 0)),
              pl.BlockSpec((1, hidden), lambda n: (0, 0)),
              pl.BlockSpec((1, hidden), lambda n: (0, 0)),
              pl.BlockSpec((hidden, oup), lambda n: (0, 0)),
              pl.BlockSpec((1, oup), lambda n: (0, 0)),
              pl.BlockSpec((1, oup), lambda n: (0, 0))]
    return args, specs


def _fused_ir_s1(x, H, W, p):
    N, HW, cin = x.shape
    hidden, oup = p["hidden"], p["oup"]
    F = _frames_per_step(N, HW)
    wargs, wspecs = _weight_specs(p, cin, hidden, oup)
    kernel = functools.partial(_fused_ir_s1_kernel, F=F, H=H, W=W,
                               expand=p["expand"], use_res=p["use_res"])
    return pl.pallas_call(
        kernel,
        grid=(N // F,),
        in_specs=[pl.BlockSpec((F, HW, cin), lambda n: (n, 0, 0))] + wspecs,
        out_specs=pl.BlockSpec((F, HW, oup), lambda n: (n, 0, 0)),
        out_shape=jax.ShapeDtypeStruct((N, HW, oup), jnp.bfloat16),
        scratch_shapes=[pltpu.VMEM((H + 2, W + 2, hidden), jnp.bfloat16),
                        pltpu.VMEM((HW, hidden), jnp.bfloat16)],
        compiler_params=_cparams(("parallel",)),
    )(x, *wargs)


def _fused_ir_s2(x, H, W, p):
    N, HW, cin = x.shape
    hidden, oup = p["hidden"], p["oup"]
    Ho, Wo = (H - 1) // 2 + 1, (W - 1) // 2 + 1
    Hp, Wp = Ho + 1, Wo + 1
    F = _frames_per_step(N, Ho * Wo)

    # parity split of the zero-padded input (XLA side, Cin-sized -> cheap)
    xp = jnp.pad(x.reshape(N, H, W, cin), ((0, 0), (1, 1), (1, 1), (0, 0)))

    def parity(r0, c0):
        m = xp[:, r0::2, c0::2, :][:, :Hp, :Wp, :]
        ph, pw = Hp - m.shape[1], Wp - m.shape[2]
        if ph or pw:
            m = jnp.pad(m, ((0, 0), (0, ph), (0, pw), (0, 0)))
        return m.reshape(N, Hp * Wp, cin)

    pmaps = [parity(0, 0), parity(0, 1), parity(1, 0), parity(1, 1)]
    pm_spec = pl.BlockSpec((F, Hp * Wp, cin), lambda n: (n, 0, 0))
    wargs, wspecs = _weight_specs(p, cin, hidden, oup)
    kernel = functools.partial(_fused_ir_s2_kernel, F=F, H=H, W=W, Ho=Ho,
                               Wo=Wo, expand=p["expand"])
    out = pl.pallas_call(
        kernel,
        grid=(N // F,),
        in_specs=[pm_spec, pm_spec, pm_spec, pm_spec] + wspecs,
        out_specs=pl.BlockSpec((F, Ho * Wo, oup), lambda n: (n, 0, 0)),
        out_shape=jax.ShapeDtypeStruct((N, Ho * Wo, oup), jnp.bfloat16),
        scratch_shapes=[pltpu.VMEM((Ho * Wo, hidden), jnp.bfloat16)],
        compiler_params=_cparams(("parallel",)),
    )(*pmaps, *wargs)
    return out, Ho, Wo


def _convl_pool(x, w, s, b):
    BT, HW, cin = x.shape
    CL = w.shape[1]
    F = _frames_per_step(BT, HW)
    out = pl.pallas_call(
        functools.partial(_convl_pool_kernel, F=F),
        grid=(BT // F,),
        in_specs=[pl.BlockSpec((F, HW, cin), lambda n: (n, 0, 0)),
                  pl.BlockSpec((cin, CL), lambda n: (0, 0)),
                  pl.BlockSpec((1, CL), lambda n: (0, 0)),
                  pl.BlockSpec((1, CL), lambda n: (0, 0))],
        out_specs=pl.BlockSpec((F, 1, CL), lambda n: (n, 0, 0)),
        out_shape=jax.ShapeDtypeStruct((BT, 1, CL), jnp.bfloat16),
        compiler_params=_cparams(("parallel",)),
    )(x, w, s, b)
    return out[:, 0, :]


def _bilstm_layer(x_btf, p, hidden, ndir):
    B, T, feat = x_btf.shape
    H4 = 4 * hidden

    # hoisted input projection: ONE (B*T, feat) x (feat, ndir*4H) bf16 matmul
    wih_cat = jnp.transpose(p["wih"], (1, 0, 2)).reshape(feat, ndir * H4)
    b_cat = jnp.transpose(p["b"], (1, 0, 2)).reshape(1, ndir * H4)
    ones = jnp.ones((1, ndir * H4), jnp.float32)
    proj = _pw_call(x_btf.reshape(B * T, feat).astype(jnp.bfloat16),
                    wih_cat, ones, b_cat, relu6=False, out_dtype=jnp.float32)
    proj = proj.reshape(B, T, ndir, H4).transpose(2, 1, 0, 3)   # (ndir,T,B,4H)

    out = pl.pallas_call(
        functools.partial(_lstm_seq_kernel, hidden=hidden, T=T, B=B),
        grid=(ndir,),
        in_specs=[pl.BlockSpec((1, T, B, H4), lambda dd: (dd, 0, 0, 0)),
                  pl.BlockSpec((1, hidden, H4), lambda dd: (dd, 0, 0))],
        out_specs=pl.BlockSpec((1, T, B, hidden), lambda dd: (dd, 0, 0, 0)),
        out_shape=jax.ShapeDtypeStruct((ndir, T, B, hidden), jnp.float32),
        compiler_params=_cparams(("parallel",)),
    )(proj, p["whh"])

    outs = [jnp.transpose(out[dd], (1, 0, 2)) for dd in range(ndir)]
    return jnp.concatenate(outs, axis=-1) if ndir > 1 else outs[0]


# ---------------------------------------------------------------------------
# JAX glue (im2col only for the first full 3x3 conv)
# ---------------------------------------------------------------------------
def _im2col_3x3(x, stride):
    # x: (N, H, W, Cin) -> (N*Ho*Wo, 9*Cin), pad=1
    N, H, W, C = x.shape
    xp = jnp.pad(x, ((0, 0), (1, 1), (1, 1), (0, 0)))
    Ho = (H + 2 - 3) // stride + 1
    Wo = (W + 2 - 3) // stride + 1
    taps = []
    for kh in range(3):
        for kw in range(3):
            taps.append(xp[:, kh:kh + (Ho - 1) * stride + 1:stride,
                           kw:kw + (Wo - 1) * stride + 1:stride, :])
    p = jnp.stack(taps, axis=3)                     # (N, Ho, Wo, 9, C)
    return p.reshape(N * Ho * Wo, 9 * C), (Ho, Wo)


# ---------------------------------------------------------------------------
# Parameters (deterministic synthetic init mirroring the PyTorch inits)
# ---------------------------------------------------------------------------
def _bn_fold(c):
    scale = jnp.full((1, c), 1.0 / math.sqrt(1.0 + BN_EPS), jnp.float32)
    bias = jnp.zeros((1, c), jnp.float32)
    return scale, bias


def _make_ir(keys, inp, oup, stride, expand_ratio):
    hidden = int(round(inp * expand_ratio))
    p = {"stride": stride, "use_res": (stride == 1 and inp == oup),
         "expand": (expand_ratio != 1), "hidden": hidden, "oup": oup}
    if expand_ratio != 1:
        std = math.sqrt(2.0 / hidden)
        p["pw1_w"] = (jax.random.normal(next(keys), (inp, hidden), jnp.float32)
                      * std).astype(jnp.bfloat16)
        p["pw1_s"], p["pw1_b"] = _bn_fold(hidden)
    std = math.sqrt(2.0 / (9 * hidden))
    p["dw_w"] = jax.random.normal(next(keys), (9, 1, hidden), jnp.float32) * std
    p["dw_s"], p["dw_b"] = _bn_fold(hidden)
    std = math.sqrt(2.0 / oup)
    p["pw2_w"] = (jax.random.normal(next(keys), (hidden, oup), jnp.float32)
                  * std).astype(jnp.bfloat16)
    p["pw2_s"], p["pw2_b"] = _bn_fold(oup)
    return p


def init_params(key, width_mult=1.0, lstm_hidden=32, lstm_layers=1,
                bidirectional=True):
    keys = iter(jax.random.split(key, 512))
    P = {}

    cin = 3
    cout = int(32 * width_mult) if width_mult >= 1.0 else 32
    std = math.sqrt(2.0 / (9 * cout))
    P["conv0_w"] = (jax.random.normal(next(keys), (9 * cin, cout), jnp.float32)
                    * std).astype(jnp.bfloat16)
    P["conv0_s"], P["conv0_b"] = _bn_fold(cout)

    settings = [[1, 16, 1, 1], [6, 24, 2, 2], [6, 32, 3, 2], [6, 64, 4, 2],
                [6, 96, 3, 1], [6, 160, 3, 2], [6, 320, 1, 1]]
    blocks = []
    input_channel = cout
    for t, c, n, s in settings:
        oup = max(int(c * width_mult), 16)
        for i in range(n):
            stride = s if i == 0 else 1
            blocks.append(_make_ir(keys, input_channel, oup, stride, t))
            input_channel = oup
    P["blocks"] = blocks

    last = int(1280 * width_mult) if width_mult > 1.0 else 1280
    std = math.sqrt(2.0 / last)
    P["convL_w"] = (jax.random.normal(next(keys), (input_channel, last),
                                      jnp.float32) * std).astype(jnp.bfloat16)
    P["convL_s"], P["convL_b"] = _bn_fold(last)

    # LSTM (batch_first, bidirectional); gates fused -> (F, 4H) per direction
    k = 1.0 / math.sqrt(lstm_hidden)
    ndir = 2 if bidirectional else 1
    lstm = []
    for layer in range(lstm_layers):
        in_sz = last if layer == 0 else ndir * lstm_hidden
        wih = jax.random.uniform(next(keys), (ndir, in_sz, 4 * lstm_hidden),
                                 jnp.float32, -k, k).astype(jnp.bfloat16)
        whh = jax.random.uniform(next(keys), (ndir, lstm_hidden, 4 * lstm_hidden),
                                 jnp.float32, -k, k).astype(jnp.bfloat16)
        bih = jax.random.uniform(next(keys), (ndir, 1, 4 * lstm_hidden),
                                 jnp.float32, -k, k)
        bhh = jax.random.uniform(next(keys), (ndir, 1, 4 * lstm_hidden),
                                 jnp.float32, -k, k)
        lstm.append({"wih": wih, "whh": whh, "b": bih + bhh})
    P["lstm"] = lstm

    lin_in = ndir * lstm_hidden
    kl = 1.0 / math.sqrt(lin_in)
    P["lin_w"] = jax.random.uniform(next(keys), (lin_in, 9), jnp.float32,
                                    -kl, kl).astype(jnp.bfloat16)
    P["lin_b"] = jax.random.uniform(next(keys), (1, 9), jnp.float32, -kl, kl)
    return P


# ---------------------------------------------------------------------------
# Forward pass
# ---------------------------------------------------------------------------
def mobilenet_features(x_nhwc, P):
    N = x_nhwc.shape[0]
    patches, (H, W) = _im2col_3x3(x_nhwc, stride=2)
    cout = P["conv0_w"].shape[1]
    y = _pw_call(patches, P["conv0_w"], P["conv0_s"], P["conv0_b"], relu6=True)
    x = y.reshape(N, H * W, cout)               # activations threaded as (N, H*W, C)

    for blk in P["blocks"]:
        if blk["stride"] == 1:
            x = _fused_ir_s1(x, H, W, blk)
        else:
            x, H, W = _fused_ir_s2(x, H, W, blk)

    pooled = _convl_pool(x, P["convL_w"], P["convL_s"], P["convL_b"])
    return pooled                                # (N, 1280) bf16


def event_detector_forward(x, params, *, lstm_hidden, lstm_layers,
                           bidirectional):
    # x: (batch, timesteps, C, H, W) float32 (PyTorch NCHW per frame)
    B, T, C, H, W = x.shape
    c_in = jnp.transpose(x.reshape(B * T, C, H, W),
                         (0, 2, 3, 1)).astype(jnp.bfloat16)        # NHWC bf16

    pooled = mobilenet_features(c_in, params)    # (B*T, 1280) bf16
    # nn.Dropout(0.5): identity at inference (eval mode)

    ndir = 2 if bidirectional else 1
    r = pooled.reshape(B, T, -1)
    for layer_p in params["lstm"]:
        r = _bilstm_layer(r, layer_p, lstm_hidden, ndir)           # (B,T,ndir*H)

    D = r.shape[-1]
    ones9 = jnp.ones((1, 9), jnp.float32)
    out = _pw_call(r.reshape(B * T, D).astype(jnp.bfloat16),
                   params["lin_w"], ones9, params["lin_b"],
                   relu6=False, out_dtype=jnp.float32)
    return out                                   # (B*T, 9) f32


if __name__ == "__main__":
    B, T, C, H, W = 2, 2, 3, 16, 16
    x = jax.random.normal(jax.random.PRNGKey(0), (B, T, C, H, W), jnp.float32)
    params = init_params(jax.random.PRNGKey(1), width_mult=1.0,
                         lstm_hidden=LSTM_HIDDEN, lstm_layers=LSTM_LAYERS,
                         bidirectional=BIDIRECTIONAL)
    out = event_detector_forward(x, params, lstm_hidden=LSTM_HIDDEN,
                                 lstm_layers=LSTM_LAYERS,
                                 bidirectional=BIDIRECTIONAL)
    out = jax.block_until_ready(out)
    assert out.shape == (B * T, 9) and out.dtype == jnp.float32
    print("KERNEL_OK")
</pallas_src>

<mosaic_0001>
module attributes {stable_mosaic.version = 11 : i64} {
  func.func @_pw_kernel(%arg0: i32, %arg1: memref<256x27xbf16, #tpu.memory_space<vmem>>, %arg2: memref<27x32xbf16, #tpu.memory_space<vmem>>, %arg3: memref<1x32xf32, #tpu.memory_space<vmem>>, %arg4: memref<1x32xf32, #tpu.memory_space<vmem>>, %arg5: memref<256x32xbf16, #tpu.memory_space<vmem>>) attributes {dimension_semantics = [#tpu.dimension_semantics<parallel>], iteration_bounds = array<i64: 1>, scalar_prefetch = 0 : i64, scratch_operands = 0 : i64, tpu.core_type = #tpu.core_type<tc>, window_params = [{transform_indices = @transform_0, window_bounds = array<i64: 256, 27>}, {pipeline_mode = #tpu.pipeline_mode<synchronous>, transform_indices = @transform_1, window_bounds = array<i64: 27, 32>}, {pipeline_mode = #tpu.pipeline_mode<synchronous>, transform_indices = @transform_2, window_bounds = array<i64: 1, 32>}, {pipeline_mode = #tpu.pipeline_mode<synchronous>, transform_indices = @transform_3, window_bounds = array<i64: 1, 32>}, {transform_indices = @transform_4, window_bounds = array<i64: 256, 32>}]} {
    %c0 = arith.constant 0 : index
    %c0_0 = arith.constant 0 : index
    %0 = vector.load %arg1[%c0, %c0_0] : memref<256x27xbf16, #tpu.memory_space<vmem>>, vector<256x27xbf16>
    %c0_1 = arith.constant 0 : index
    %c0_2 = arith.constant 0 : index
    %1 = vector.load %arg2[%c0_1, %c0_2] : memref<27x32xbf16, #tpu.memory_space<vmem>>, vector<27x32xbf16>
    %cst = arith.constant dense<0.000000e+00> : vector<256x32xf32>
    %2 = tpu.matmul %0, %1, %cst {dimension_numbers = #tpu.dot_dimension_numbers<[1], [0], [0], [1], [0, 0, 1, 1], [], []>} : vector<256x27xbf16>, vector<27x32xbf16>, vector<256x32xf32> -> vector<256x32xf32>
    %c0_3 = arith.constant 0 : index
    %c0_4 = arith.constant 0 : index
    %3 = vector.load %arg3[%c0_3, %c0_4] : memref<1x32xf32, #tpu.memory_space<vmem>>, vector<1x32xf32>
    %4 = vector.broadcast %3 : vector<1x32xf32> to vector<256x32xf32>
    %5 = arith.mulf %2, %4 : vector<256x32xf32>
    %c0_5 = arith.constant 0 : index
    %c0_6 = arith.constant 0 : index
    %6 = vector.load %arg4[%c0_5, %c0_6] : memref<1x32xf32, #tpu.memory_space<vmem>>, vector<1x32xf32>
    %7 = vector.broadcast %6 : vector<1x32xf32> to vector<256x32xf32>
    %8 = arith.addf %5, %7 : vector<256x32xf32>
    %cst_7 = arith.constant 0.000000e+00 : f32
    %cst_8 = arith.constant 6.000000e+00 : f32
    %9 = vector.broadcast %cst_7 : f32 to vector<256x32xf32>
    %10 = arith.maximumf %9, %8 : vector<256x32xf32>
    %11 = vector.broadcast %cst_8 : f32 to vector<256x32xf32>
    %12 = arith.minimumf %11, %10 : vector<256x32xf32>
    %13 = arith.truncf %12 : vector<256x32xf32> to vector<256x32xbf16>
    %c0_9 = arith.constant 0 : index
    %c0_10 = arith.constant 0 : index
    %14 = vector.load %arg5[%c0_9, %c0_10] : memref<256x32xbf16, #tpu.memory_space<vmem>>, vector<256x32xbf16>
    tpu.vector_store %arg5[%c0_9, %c0_10], %13 {strides = array<i32>} : memref<256x32xbf16, #tpu.memory_space<vmem>>, vector<256x32xbf16>,
    return
  }
  func.func @transform_0(%arg0: i32) -> (i32, i32) {
    %c0_i32 = arith.constant 0 : i32
    %c0_i32_0 = arith.constant 0 : i32
    return %arg0, %c0_i32 : i32, i32
  }
  func.func @transform_1(%arg0: i32) -> (i32, i32) {
    %c0_i32 = arith.constant 0 : i32
    %c0_i32_0 = arith.constant 0 : i32
    %c0_i32_1 = arith.constant 0 : i32
    return %c0_i32, %c0_i32_0 : i32, i32
  }
  func.func @transform_2(%arg0: i32) -> (i32, i32) {
    %c0_i32 = arith.constant 0 : i32
    %c0_i32_0 = arith.constant 0 : i32
    %c0_i32_1 = arith.constant 0 : i32
    return %c0_i32, %c0_i32_0 : i32, i32
  }
  func.func @transform_3(%arg0: i32) -> (i32, i32) {
    %c0_i32 = arith.constant 0 : i32
    %c0_i32_0 = arith.constant 0 : i32
    %c0_i32_1 = arith.constant 0 : i32
    return %c0_i32, %c0_i32_0 : i32, i32
  }
  func.func @transform_4(%arg0: i32) -> (i32, i32) {
    %c0_i32 = arith.constant 0 : i32
    %c0_i32_0 = arith.constant 0 : i32
    return %arg0, %c0_i32 : i32, i32
  }
}

</mosaic_0001>

<bundles_post_ra>
// kernel: tpu_custom_call.1
= control target key start
LH: loop header
LB: loop body
LE: loop exit
PB: predicated region body
PF: predicated region fallthrough
CT: control target
= control target key end

     0   :  { %vm194_vm0 = vcmask 1044480   ;;  %vm195_vm1 = vcmask 1045504   ;;  %vm145_vm2 = vcmask 220160   ;;  %v846_v1 = vmov 65535   ;;  %s1144_s1 = inlined_call_operand.vmem [shape: bf16[27,32], index: 1, kind: input, shape index: {}]   ;;  %s1145_s0 = inlined_call_operand.vmem [shape: bf16[256,27], index: 0, kind: input, shape index: {}]   ;;  %s1146_s2 = inlined_call_operand.vmem [shape: f32[1,32], index: 2, kind: input, shape index: {}]   ;;  %s1147_s3 = inlined_call_operand.vmem [shape: f32[1,32], index: 3, kind: input, shape index: {}]   ;;  %s1148_s4 = inlined_call_operand.vmem [shape: bf16[256,32], index: 4, kind: output, shape index: {}]  }
   0x1   :  { %v828_v0 = vld [vmem:[%s1144_s1] sm:$0xff]   ;;  %v196_v2 = vsel %vm194_vm0, 4294967295, %v846_v1  ;;  %v829_v3 = vld [vmem:[%s1144_s1 + $0x8] sm:$0x3f]   ;;  %v834_v10 = vld [vmem:[%s1145_s0 + $0x10] sm:$0xff]   ;;  %vm632_vm3 = vcmask 257024  }
   0x2   :  { %787 = vmatprep.subr.bf16.mxu0 %v828_v0  ;;  %823 = vmatprep.subr.bf16.mxu1 %v828_v0  ;;  %v197_v4 = vsel %vm195_vm1, %v196_v2, 0  ;;  %v830_v5 = vld [vmem:[%s1145_s0] sm:$0xff]   ;;  %v832_v8 = vld [vmem:[%s1145_s0 + $0x8] sm:$0xff]   ;;  %v835_v11 = vld [vmem:[%s1145_s0 + $0x50] sm:$0xff]  }
   0x3   :  { %788 = vmatpush3.bf16.msra.mxu0 %v828_v0  ;;  %825 = vmatpush3.bf16.msra.mxu1 %v828_v0  ;;  %v199_v6 = vand.u32 %v829_v3, %v197_v4  ;;  %v831_v7 = vld [vmem:[%s1145_s0 + $0x40] sm:$0xff]   ;;  %v833_v9 = vld [vmem:[%s1145_s0 + $0x48] sm:$0xff]   ;;  %v836_v12 = vld [vmem:[%s1145_s0 + $0x18] sm:$0xff]  }
   0x4   :  { %791 = vmatprep.mubr.msk.bf16.mxu0 %vm145_vm2, %v830_v5  ;;  %807 = vmatprep.mubr.msk.bf16.mxu1 %vm145_vm2, %v831_v7  ;;  %v837_v13 = vld [vmem:[%s1145_s0 + $0x58] sm:$0xff]   ;;  %v838_v14 = vld [vmem:[%s1145_s0 + $0x20] sm:$0xff]   ;;  %v840_v16 = vld [vmem:[%s1145_s0 + $0x28] sm:$0xff]  }
   0x5   :  { %789 = vmatprep.subr.bf16.mxu0 %v199_v6  ;;  %824 = vmatprep.subr.bf16.mxu1 %v199_v6  ;;  %v839_v15 = vld [vmem:[%s1145_s0 + $0x60] sm:$0xff]   ;;  %v841_v17 = vld [vmem:[%s1145_s0 + $0x68] sm:$0xff]   ;;  %v842_v18 = vld [vmem:[%s1145_s0 + $0x30] sm:$0xff]  }
   0x6   :  { %v843_v19 = vld [vmem:[%s1145_s0 + $0x70] sm:$0xff]   ;;  %v844_v20 = vld [vmem:[%s1145_s0 + $0x38] sm:$0xff]   ;;  %v945_v22 = vld [vmem:[%s1146_s2] ss:$0 sm:$0xff] }
   0x7   :  { %790 = vmatpush3.bf16.msra.mxu0 %v199_v6  ;;  %826 = vmatpush3.bf16.msra.mxu1 %v199_v6  ;;  %v845_v21 = vld [vmem:[%s1145_s0 + $0x78] sm:$0xff]   ;;  %v950_v24 = vld [vmem:[%s1147_s3] ss:$0 sm:$0xff] }
   0xa   :  { %792 = vmatmul.mubr.msk.bf16.vlgmr.msra.gmra.mrb[0].mxu0 %vm145_vm2, %v832_v8  ;;  %808 = vmatmul.mubr.msk.bf16.vlgmr.msra.gmra.mrb[0].mxu1 %vm145_vm2, %v833_v9 }
   0xb   :  { %795 = vmatprep.mubr.msk.bf16.mxu0 %vm145_vm2, %v834_v10  ;;  %811 = vmatprep.mubr.msk.bf16.mxu1 %vm145_vm2, %v835_v11 }
  0x12   :  { %796 = vmatmul.mubr.msk.bf16.gmra.mrb[4].mxu0 %vm145_vm2, %v836_v12  ;;  %812 = vmatmul.mubr.msk.bf16.gmra.mrb[4].mxu1 %vm145_vm2, %v837_v13 }
  0x13   :  { %799 = vmatprep.mubr.msk.bf16.mxu0 %vm145_vm2, %v838_v14  ;;  %815 = vmatprep.mubr.msk.bf16.mxu1 %vm145_vm2, %v839_v15 }
  0x1a   :  { %800 = vmatmul.mubr.msk.bf16.gmra.mrb[8].mxu0 %vm145_vm2, %v840_v16  ;;  %816 = vmatmul.mubr.msk.bf16.gmra.mrb[8].mxu1 %vm145_vm2, %v841_v17 }
  0x1b   :  { %803 = vmatprep.mubr.msk.bf16.mxu0 %vm145_vm2, %v842_v18  ;;  %819 = vmatprep.mubr.msk.bf16.mxu1 %vm145_vm2, %v843_v19 }
  0x22   :  { %804 = vmatmul.mubr.msk.bf16.gmra.mrb[12].mxu0 %vm145_vm2, %v844_v20  ;;  %820 = vmatmul.mubr.msk.bf16.gmra.mrb[12].mxu1 %vm145_vm2, %v845_v21 }
  0xdd   :  { %v793_v23 = vpop.f32.mrb[0].mxu0  ;;  %v809_v25 = vpop.f32.mrb[0].mxu1 }
  0xde   :  { %v371_v26 = vmul.f32 %v793_v23, %v945_v22  ;;  %v387_v27 = vmul.f32 %v809_v25, %v945_v22  ;;  %v235_v28 = vpop.f32.mrb[1].mxu0  ;;  %v299_v29 = vpop.f32.mrb[1].mxu1 }
  0xdf   :  { %v369_v30 = vmul.f32 %v945_v22, %v235_v28  ;;  %v385_v31 = vmul.f32 %v945_v22, %v299_v29  ;;  %v794_v32 = vpop.f32.mrb[2].mxu0  ;;  %v810_v33 = vpop.f32.mrb[2].mxu1 }
  0xe0   :  { %v410_v34 = vadd.f32 %v950_v24, %v371_v26  ;;  %v426_v35 = vadd.f32 %v950_v24, %v387_v27  ;;  %v372_v36 = vmul.f32 %v794_v32, %v945_v22  ;;  %v388_v37 = vmul.f32 %v810_v33, %v945_v22  ;;  %v238_v38 = vpop.f32.mrb[3].mxu0  ;;  %v302_v39 = vpop.f32.mrb[3].mxu1 }
  0xe1   :  { %v408_v40 = vadd.f32 %v950_v24, %v369_v30  ;;  %v424_v41 = vadd.f32 %v950_v24, %v385_v31  ;;  %v370_v42 = vmul.f32 %v945_v22, %v238_v38  ;;  %v386_v43 = vmul.f32 %v945_v22, %v302_v39 }
  0xe2   :  { %v442_v44 = vmax.f32 %v410_v34, 0.0  ;;  %v458_v45 = vmax.f32 %v426_v35, 0.0  ;;  %v411_v46 = vadd.f32 %v950_v24, %v372_v36  ;;  %v427_v47 = vadd.f32 %v950_v24, %v388_v37 }
  0xe3   :  { %v440_v48 = vmax.f32 %v408_v40, 0.0  ;;  %v456_v49 = vmax.f32 %v424_v41, 0.0  ;;  %v409_v50 = vadd.f32 %v950_v24, %v370_v42  ;;  %v425_v51 = vadd.f32 %v950_v24, %v386_v43 }
  0xe4   :  { %v474_v52 = vmin.f32 %v442_v44, 6.0  ;;  %v490_v53 = vmin.f32 %v458_v45, 6.0  ;;  %v443_v54 = vmax.f32 %v411_v46, 0.0  ;;  %v459_v55 = vmax.f32 %v427_v47, 0.0 }
  0xe5   :  { %v472_v56 = vmin.f32 %v440_v48, 6.0  ;;  %v488_v57 = vmin.f32 %v456_v49, 6.0  ;;  %v441_v58 = vmax.f32 %v409_v50, 0.0  ;;  %v457_v59 = vmax.f32 %v425_v51, 0.0  ;;  %v797_v60 = vpop.f32.mrb[4].mxu0  ;;  %v813_v61 = vpop.f32.mrb[4].mxu1 }
  0xe6   :  { %v739_v62 = vpack.c.bf16 %v474_v52, %v474_v52  ;;  %v755_v63 = vpack.c.bf16 %v490_v53, %v490_v53  ;;  %v475_v0 = vmin.f32 %v443_v54, 6.0  ;;  %v491_v1 = vmin.f32 %v459_v55, 6.0  ;;  %v251_v2 = vpop.f32.mrb[5].mxu0  ;;  %v315_v3 = vpop.f32.mrb[5].mxu1 }
  0xe7   :  { %v737_v4 = vpack.c.bf16 %v472_v56, %v472_v56  ;;  %v753_v5 = vpack.c.bf16 %v488_v57, %v488_v57  ;;  %v473_v6 = vmin.f32 %v441_v58, 6.0  ;;  %v489_v7 = vmin.f32 %v457_v59, 6.0  ;;  %v798_v8 = vpop.f32.mrb[6].mxu0  ;;  %v814_v9 = vpop.f32.mrb[6].mxu1 }
  0xe8   :  { %635 = vst.msk [vmem:[%s1148_s4 + $0x8] sm:$0xf] %vm632_vm3, %v739_v62  ;;  %651 = vst.msk [vmem:[%s1148_s4 + $0x48] sm:$0xf] %vm632_vm3, %v755_v63  ;;  %v740_v10 = vpack.c.bf16 %v475_v0, %v475_v0  ;;  %v756_v11 = vpack.c.bf16 %v491_v1, %v491_v1  ;;  %v375_v12 = vmul.f32 %v797_v60, %v945_v22  ;;  %v254_v14 = vpop.f32.mrb[7].mxu0  ;;  %v318_v15 = vpop.f32.mrb[7].mxu1 }
  0xe9   :  { %v391_v13 = vmul.f32 %v813_v61, %v945_v22  ;;  %633 = vst.msk [vmem:[%s1148_s4] sm:$0xf] %vm632_vm3, %v737_v4  ;;  %649 = vst.msk [vmem:[%s1148_s4 + $0x40] sm:$0xf] %vm632_vm3, %v753_v5  ;;  %v738_v16 = vpack.c.bf16 %v473_v6, %v473_v6  ;;  %v754_v17 = vpack.c.bf16 %v489_v7, %v489_v7 }
  0xea   :  { %v373_v18 = vmul.f32 %v945_v22, %v251_v2  ;;  %v389_v19 = vmul.f32 %v945_v22, %v315_v3  ;;  %636 = vst.msk [vmem:[%s1148_s4 + $0xc] sm:$0xf] %vm632_vm3, %v740_v10  ;;  %652 = vst.msk [vmem:[%s1148_s4 + $0x4c] sm:$0xf] %vm632_vm3, %v756_v11  ;;  %v414_v20 = vadd.f32 %v950_v24, %v375_v12 }
  0xeb   :  { %v430_v21 = vadd.f32 %v950_v24, %v391_v13  ;;  %v376_v23 = vmul.f32 %v798_v8, %v945_v22  ;;  %v392_v25 = vmul.f32 %v814_v9, %v945_v22  ;;  %634 = vst.msk [vmem:[%s1148_s4 + $0x4] sm:$0xf] %vm632_vm3, %v738_v16  ;;  %650 = vst.msk [vmem:[%s1148_s4 + $0x44] sm:$0xf] %vm632_vm3, %v754_v17 }
  0xec   :  { %v412_v26 = vadd.f32 %v950_v24, %v373_v18  ;;  %v428_v27 = vadd.f32 %v950_v24, %v389_v19  ;;  %v374_v28 = vmul.f32 %v945_v22, %v254_v14  ;;  %v390_v29 = vmul.f32 %v945_v22, %v318_v15 }
  0xed   :  { %v446_v30 = vmax.f32 %v414_v20, 0.0  ;;  %v462_v31 = vmax.f32 %v430_v21, 0.0  ;;  %v415_v32 = vadd.f32 %v950_v24, %v376_v23  ;;  %v431_v33 = vadd.f32 %v950_v24, %v392_v25  ;;  %v801_v38 = vpop.f32.mrb[8].mxu0  ;;  %v817_v39 = vpop.f32.mrb[8].mxu1 }
  0xee   :  { %v444_v34 = vmax.f32 %v412_v26, 0.0  ;;  %v460_v35 = vmax.f32 %v428_v27, 0.0  ;;  %v413_v36 = vadd.f32 %v950_v24, %v374_v28  ;;  %v429_v37 = vadd.f32 %v950_v24, %v390_v29  ;;  %v267_v44 = vpop.f32.mrb[9].mxu0  ;;  %v331_v45 = vpop.f32.mrb[9].mxu1 }
  0xef   :  { %v478_v40 = vmin.f32 %v446_v30, 6.0  ;;  %v494_v41 = vmin.f32 %v462_v31, 6.0  ;;  %v447_v42 = vmax.f32 %v415_v32, 0.0  ;;  %v463_v43 = vmax.f32 %v431_v33, 0.0  ;;  %v802_v50 = vpop.f32.mrb[10].mxu0  ;;  %v818_v51 = vpop.f32.mrb[10].mxu1 }
  0xf0   :  { %v476_v46 = vmin.f32 %v444_v34, 6.0  ;;  %v492_v47 = vmin.f32 %v460_v35, 6.0  ;;  %v445_v48 = vmax.f32 %v413_v36, 0.0  ;;  %v461_v49 = vmax.f32 %v429_v37, 0.0  ;;  %v270_v56 = vpop.f32.mrb[11].mxu0  ;;  %v334_v57 = vpop.f32.mrb[11].mxu1 }
  0xf1   :  { %v743_v52 = vpack.c.bf16 %v478_v40, %v478_v40  ;;  %v759_v53 = vpack.c.bf16 %v494_v41, %v494_v41  ;;  %v479_v54 = vmin.f32 %v447_v42, 6.0  ;;  %v495_v55 = vmin.f32 %v463_v43, 6.0 }
  0xf2   :  { %v741_v58 = vpack.c.bf16 %v476_v46, %v476_v46  ;;  %v757_v59 = vpack.c.bf16 %v492_v47, %v492_v47  ;;  %v477_v60 = vmin.f32 %v445_v48, 6.0  ;;  %v493_v61 = vmin.f32 %v461_v49, 6.0 }
  0xf3   :  { %639 = vst.msk [vmem:[%s1148_s4 + $0x18] sm:$0xf] %vm632_vm3, %v743_v52  ;;  %655 = vst.msk [vmem:[%s1148_s4 + $0x58] sm:$0xf] %vm632_vm3, %v759_v53  ;;  %v744_v62 = vpack.c.bf16 %v479_v54, %v479_v54  ;;  %v760_v63 = vpack.c.bf16 %v495_v55, %v495_v55  ;;  %v379_v0 = vmul.f32 %v801_v38, %v945_v22 }
  0xf4   :  { %v395_v1 = vmul.f32 %v817_v39, %v945_v22  ;;  %637 = vst.msk [vmem:[%s1148_s4 + $0x10] sm:$0xf] %vm632_vm3, %v741_v58  ;;  %653 = vst.msk [vmem:[%s1148_s4 + $0x50] sm:$0xf] %vm632_vm3, %v757_v59  ;;  %v742_v2 = vpack.c.bf16 %v477_v60, %v477_v60  ;;  %v758_v3 = vpack.c.bf16 %v493_v61, %v493_v61 }
  0xf5   :  { %v377_v4 = vmul.f32 %v945_v22, %v267_v44  ;;  %v393_v5 = vmul.f32 %v945_v22, %v331_v45  ;;  %640 = vst.msk [vmem:[%s1148_s4 + $0x1c] sm:$0xf] %vm632_vm3, %v744_v62  ;;  %656 = vst.msk [vmem:[%s1148_s4 + $0x5c] sm:$0xf] %vm632_vm3, %v760_v63  ;;  %v418_v6 = vadd.f32 %v950_v24, %v379_v0  ;;  %v805_v14 = vpop.f32.mrb[12].mxu0  ;;  %v821_v15 = vpop.f32.mrb[12].mxu1 }
  0xf6   :  { %v434_v7 = vadd.f32 %v950_v24, %v395_v1  ;;  %v380_v8 = vmul.f32 %v802_v50, %v945_v22  ;;  %v396_v9 = vmul.f32 %v818_v51, %v945_v22  ;;  %638 = vst.msk [vmem:[%s1148_s4 + $0x14] sm:$0xf] %vm632_vm3, %v742_v2  ;;  %654 = vst.msk [vmem:[%s1148_s4 + $0x54] sm:$0xf] %vm632_vm3, %v758_v3  ;;  %v283_v20 = vpop.f32.mrb[13].mxu0  ;;  %v347_v21 = vpop.f32.mrb[13].mxu1 }
  0xf7   :  { %v416_v10 = vadd.f32 %v950_v24, %v377_v4  ;;  %v432_v11 = vadd.f32 %v950_v24, %v393_v5  ;;  %v378_v12 = vmul.f32 %v945_v22, %v270_v56  ;;  %v394_v13 = vmul.f32 %v945_v22, %v334_v57  ;;  %v806_v28 = vpop.f32.mrb[14].mxu0  ;;  %v822_v29 = vpop.f32.mrb[14].mxu1 }
  0xf8   :  { %v450_v16 = vmax.f32 %v418_v6, 0.0  ;;  %v466_v17 = vmax.f32 %v434_v7, 0.0  ;;  %v419_v18 = vadd.f32 %v950_v24, %v380_v8  ;;  %v435_v19 = vadd.f32 %v950_v24, %v396_v9  ;;  %v286_v34 = vpop.f32.mrb[15].mxu0  ;;  %v350_v35 = vpop.f32.mrb[15].mxu1 }
  0xf9   :  { %v448_v23 = vmax.f32 %v416_v10, 0.0  ;;  %v464_v25 = vmax.f32 %v432_v11, 0.0  ;;  %v417_v26 = vadd.f32 %v950_v24, %v378_v12  ;;  %v433_v27 = vadd.f32 %v950_v24, %v394_v13 }
  0xfa   :  { %v482_v30 = vmin.f32 %v450_v16, 6.0  ;;  %v498_v31 = vmin.f32 %v466_v17, 6.0  ;;  %v451_v32 = vmax.f32 %v419_v18, 0.0  ;;  %v467_v33 = vmax.f32 %v435_v19, 0.0 }
  0xfb   :  { %v480_v36 = vmin.f32 %v448_v23, 6.0  ;;  %v496_v37 = vmin.f32 %v464_v25, 6.0  ;;  %v449_v38 = vmax.f32 %v417_v26, 0.0  ;;  %v465_v39 = vmax.f32 %v433_v27, 0.0 }
  0xfc   :  { %v747_v40 = vpack.c.bf16 %v482_v30, %v482_v30  ;;  %v763_v41 = vpack.c.bf16 %v498_v31, %v498_v31  ;;  %v483_v42 = vmin.f32 %v451_v32, 6.0  ;;  %v499_v43 = vmin.f32 %v467_v33, 6.0 }
  0xfd   :  { %v745_v44 = vpack.c.bf16 %v480_v36, %v480_v36  ;;  %v761_v45 = vpack.c.bf16 %v496_v37, %v496_v37  ;;  %v481_v46 = vmin.f32 %v449_v38, 6.0  ;;  %v497_v47 = vmin.f32 %v465_v39, 6.0 }
  0xfe   :  { %643 = vst.msk [vmem:[%s1148_s4 + $0x28] sm:$0xf] %vm632_vm3, %v747_v40  ;;  %659 = vst.msk [vmem:[%s1148_s4 + $0x68] sm:$0xf] %vm632_vm3, %v763_v41  ;;  %v748_v48 = vpack.c.bf16 %v483_v42, %v483_v42  ;;  %v764_v49 = vpack.c.bf16 %v499_v43, %v499_v43  ;;  %v383_v50 = vmul.f32 %v805_v14, %v945_v22 }
  0xff   :  { %v399_v51 = vmul.f32 %v821_v15, %v945_v22  ;;  %641 = vst.msk [vmem:[%s1148_s4 + $0x20] sm:$0xf] %vm632_vm3, %v745_v44  ;;  %657 = vst.msk [vmem:[%s1148_s4 + $0x60] sm:$0xf] %vm632_vm3, %v761_v45  ;;  %v746_v52 = vpack.c.bf16 %v481_v46, %v481_v46  ;;  %v762_v53 = vpack.c.bf16 %v497_v47, %v497_v47 }
 0x100   :  { %v381_v54 = vmul.f32 %v945_v22, %v283_v20  ;;  %v397_v55 = vmul.f32 %v945_v22, %v347_v21  ;;  %644 = vst.msk [vmem:[%s1148_s4 + $0x2c] sm:$0xf] %vm632_vm3, %v748_v48  ;;  %660 = vst.msk [vmem:[%s1148_s4 + $0x6c] sm:$0xf] %vm632_vm3, %v764_v49  ;;  %v422_v56 = vadd.f32 %v950_v24, %v383_v50 }
 0x101   :  { %v438_v57 = vadd.f32 %v950_v24, %v399_v51  ;;  %v384_v58 = vmul.f32 %v806_v28, %v945_v22  ;;  %v400_v59 = vmul.f32 %v822_v29, %v945_v22  ;;  %642 = vst.msk [vmem:[%s1148_s4 + $0x24] sm:$0xf] %vm632_vm3, %v746_v52  ;;  %658 = vst.msk [vmem:[%s1148_s4 + $0x64] sm:$0xf] %vm632_vm3, %v762_v53 }
 0x102   :  { %v420_v60 = vadd.f32 %v950_v24, %v381_v54  ;;  %v436_v61 = vadd.f32 %v950_v24, %v397_v55  ;;  %v382_v62 = vmul.f32 %v945_v22, %v286_v34  ;;  %v398_v63 = vmul.f32 %v945_v22, %v350_v35 }
 0x103   :  { %v454_v0 = vmax.f32 %v422_v56, 0.0  ;;  %v470_v1 = vmax.f32 %v438_v57, 0.0  ;;  %v423_v2 = vadd.f32 %v950_v24, %v384_v58  ;;  %v439_v3 = vadd.f32 %v950_v24, %v400_v59 }
 0x104   :  { %v452_v4 = vmax.f32 %v420_v60, 0.0  ;;  %v468_v5 = vmax.f32 %v436_v61, 0.0  ;;  %v421_v6 = vadd.f32 %v950_v24, %v382_v62  ;;  %v437_v7 = vadd.f32 %v950_v24, %v398_v63 }
 0x105   :  { %v486_v8 = vmin.f32 %v454_v0, 6.0  ;;  %v502_v9 = vmin.f32 %v470_v1, 6.0  ;;  %v455_v10 = vmax.f32 %v423_v2, 0.0  ;;  %v471_v11 = vmax.f32 %v439_v3, 0.0 }
 0x106   :  { %v484_v12 = vmin.f32 %v452_v4, 6.0  ;;  %v500_v13 = vmin.f32 %v468_v5, 6.0  ;;  %v453_v14 = vmax.f32 %v421_v6, 0.0  ;;  %v469_v22 = vmax.f32 %v437_v7, 0.0 }
 0x107   :  { %v751_v15 = vpack.c.bf16 %v486_v8, %v486_v8  ;;  %v767_v16 = vpack.c.bf16 %v502_v9, %v502_v9  ;;  %v487_v17 = vmin.f32 %v455_v10, 6.0  ;;  %v503_v18 = vmin.f32 %v471_v11, 6.0 }
 0x108   :  { %v749_v19 = vpack.c.bf16 %v484_v12, %v484_v12  ;;  %v765_v20 = vpack.c.bf16 %v500_v13, %v500_v13  ;;  %v485_v21 = vmin.f32 %v453_v14, 6.0  ;;  %v501_v23 = vmin.f32 %v469_v22, 6.0 }
 0x109   :  { %647 = vst.msk [vmem:[%s1148_s4 + $0x38] sm:$0xf] %vm632_vm3, %v751_v15  ;;  %663 = vst.msk [vmem:[%s1148_s4 + $0x78] sm:$0xf] %vm632_vm3, %v767_v16  ;;  %v752_v24 = vpack.c.bf16 %v487_v17, %v487_v17  ;;  %v768_v25 = vpack.c.bf16 %v503_v18, %v503_v18 }
 0x10a   :  { %645 = vst.msk [vmem:[%s1148_s4 + $0x30] sm:$0xf] %vm632_vm3, %v749_v19  ;;  %661 = vst.msk [vmem:[%s1148_s4 + $0x70] sm:$0xf] %vm632_vm3, %v765_v20  ;;  %v750_v26 = vpack.c.bf16 %v485_v21, %v485_v21  ;;  %v766_v27 = vpack.c.bf16 %v501_v23, %v501_v23 }
 0x10b   :  { %648 = vst.msk [vmem:[%s1148_s4 + $0x3c] sm:$0xf] %vm632_vm3, %v752_v24  ;;  %664 = vst.msk [vmem:[%s1148_s4 + $0x7c] sm:$0xf] %vm632_vm3, %v768_v25 }
 0x10c   :  { %646 = vst.msk [vmem:[%s1148_s4 + $0x34] sm:$0xf] %vm632_vm3, %v750_v26  ;;  %662 = vst.msk [vmem:[%s1148_s4 + $0x74] sm:$0xf] %vm632_vm3, %v766_v27 }

</bundles_post_ra>
